<compile_context>
chip_gen: v5e
topology: v5e:2x2
jax: 0.10.0
libtpu: 0.0.40
codegen_flags: <defaults>
</compile_context>

<pallas_src>
import functools

import numpy as np
import jax
import jax.numpy as jnp
from jax.experimental import pallas as pl
from jax.experimental.pallas import tpu as pltpu


# ----------------------------- kernels ------------------------------------


def _spectral_conv0d_single_kernel(x_ref, h_ref, o_ref):
    # out = x @ H ; H = F @ G with the spectral weights already folded in.
    x = x_ref[...].astype(jnp.bfloat16)
    o_ref[...] = jnp.dot(
        x, h_ref[...], preferred_element_type=jnp.float32
    ).astype(o_ref.dtype)


def _spectral_conv0d_factored_kernel(x_ref, f_ref, g_ref, o_ref):
    # xri = [Re(x_ft) | Im(x_ft)] (truncated, lane-padded), then inverse DFT.
    x = x_ref[...].astype(jnp.bfloat16)
    xri = jnp.dot(x, f_ref[...], preferred_element_type=jnp.float32)
    o_ref[...] = jnp.dot(
        xri.astype(jnp.bfloat16), g_ref[...], preferred_element_type=jnp.float32
    ).astype(o_ref.dtype)


# ----------------------------- helpers -------------------------------------


def _round_up(v, m):
    return (v + m - 1) // m * m


def _cdiv(a, b):
    return -(-a // b)


def _vmem_capacity_bytes():
    """Physical VMEM capacity of the current generation (safe fallback = v7x)."""
    try:
        cap = int(pltpu.get_tpu_info().vmem_capacity_bytes)
        if cap >= 16 * 1024 * 1024:
            return cap
    except Exception:
        pass
    return 64 * 1024 * 1024


@functools.lru_cache(maxsize=None)
def _dft_matrices_np(n, modes, m2_pad):
    """Weight-independent DFT matrices as *numpy* arrays (host-cached).

    Returns:
      F  : [n, m2_pad]  forward rDFT, columns [cos | -sin] for kept modes
                        (padded columns are exactly zero).
      Gc : [modes, n]   inverse rDFT real-part rows (with ck/n scaling).
      Gs : [modes, n]   inverse rDFT imag-part rows (DC/Nyquist rows zeroed).
    """
    t = np.arange(n, dtype=np.float64)[:, None]
    k = np.arange(modes, dtype=np.float64)[None, :]
    ang = 2.0 * np.pi * t * k / n                      # [n, modes]
    F = np.zeros((n, m2_pad), dtype=np.float32)
    F[:, :modes] = np.cos(ang)
    F[:, modes:2 * modes] = -np.sin(ang)

    ck = np.full((modes,), 2.0, dtype=np.float64)
    ck[0] = 1.0
    has_nyquist = (n % 2 == 0) and (modes - 1 == n // 2)
    if has_nyquist:
        ck[-1] = 1.0
    ang_i = ang.T                                      # [modes, n]
    Gc = ((ck[:, None] / n) * np.cos(ang_i)).astype(np.float32)
    Gs = (-(ck[:, None] / n) * np.sin(ang_i)).astype(np.float32)
    Gs[0, :] = 0.0               # irfft ignores imag part of the DC bin
    if has_nyquist:
        Gs[-1, :] = 0.0          # ... and of the Nyquist bin
    return F, Gc, Gs


# ----------------------------- wrapper -------------------------------------


def spectral_conv0d(x, weights, *, block_b=None):
    """x: [batch, n] float ; weights: [in_channels, modes] complex64."""
    b, n = x.shape
    modes = weights.shape[1]
    assert modes <= n // 2 + 1
    m2 = 2 * modes
    m2_pad = _round_up(m2, 128)

    # --- generation-aware VMEM budget (v5e/v6e: 128 MiB, v7x: 64 MiB) -------
    cap = _vmem_capacity_bytes()
    vmem_limit = min(cap * 3 // 4, 112 * 1024 * 1024)   # ~48 MiB v7x / ~96 MiB v5e,v6e
    budget = max(8 * 1024 * 1024, vmem_limit - 6 * 1024 * 1024)

    # --- path selection (batch-aware: only pre-multiply H = F @ G when the
    #     kernel FLOPs dominate the pre-multiply and H fits comfortably) -----
    use_single = (n <= 2 * m2_pad) and (b >= m2_pad) and (2 * n * n <= budget // 2)

    # Resident-matrix bytes (bf16, single-buffered) and per-batch-row VMEM
    # (double-buffered f32 x/out tiles + in-kernel bf16/f32 temporaries).
    if use_single:
        mat_vmem = 2 * n * n
        per_row = 18 * n
    else:
        mat_vmem = 4 * n * m2_pad
        per_row = 18 * n + 6 * m2_pad

    # If even a minimal tile would not fit, raise the limit toward the physical
    # capacity rather than failing outright (extreme-n corner case).
    need_min = mat_vmem + 8 * per_row + 4 * 1024 * 1024
    if need_min > budget:
        vmem_limit = min(cap - 2 * 1024 * 1024, need_min + 4 * 1024 * 1024)
        budget = max(need_min, vmem_limit - 2 * 1024 * 1024)

    max_block_b = (budget - mat_vmem) // per_row
    max_block_b = max(8, min(1024, max_block_b)) // 8 * 8

    # --- batch tiling: no pad blowup (at most one ragged 8-row group) -------
    if block_b is not None:
        block_b = max(8, _round_up(int(block_b), 8))
        if block_b >= b:
            block_b = b
    else:
        nb = _cdiv(b, max_block_b)
        block_b = b if nb == 1 else _round_up(_cdiv(b, nb), 8)
    gb = _cdiv(b, block_b)

    # --- column tiling: keep both v7x TensorCores busy when gb == 1 ---------
    if gb == 1 and n >= 512:
        tile_n = 256
        gn = _cdiv(n, tile_n)
    else:
        tile_n = n
        gn = 1
    n_mat = tile_n * gn          # matrix column dim (>= n; padded cols are zero)

    # --- build the (weight-folded) DFT matrices -----------------------------
    F_np, Gc_np, Gs_np = _dft_matrices_np(n, modes, m2_pad)
    wsum = jnp.sum(weights, axis=0)
    wr = jnp.real(wsum).astype(jnp.float32)[:, None]           # [modes, 1]
    wi = jnp.imag(wsum).astype(jnp.float32)[:, None]
    Gc = jnp.asarray(Gc_np)
    Gs = jnp.asarray(Gs_np)
    # einsum('bx,ox->bx', x_ft, weights) == x_ft * sum_o weights[o, :]
    #   out = Xr @ (wr*Gc + wi*Gs) + Xi @ (wr*Gs - wi*Gc)
    G = jnp.zeros((m2_pad, n_mat), jnp.float32)
    G = G.at[:modes, :n].set(wr * Gc + wi * Gs)
    G = G.at[modes:m2, :n].set(wr * Gs - wi * Gc)
    F = jnp.asarray(F_np)

    x32 = x.astype(jnp.float32)
    out_shape = jax.ShapeDtypeStruct((b, n), jnp.float32)
    grid = (gb, gn)
    x_spec = pl.BlockSpec((block_b, n), lambda i, j: (i, 0))
    out_spec = pl.BlockSpec((block_b, tile_n), lambda i, j: (i, j))
    cparams = pltpu.CompilerParams(
        dimension_semantics=("parallel", "parallel"),
        vmem_limit_bytes=int(vmem_limit),
    )

    if use_single:
        # Fold forward + inverse DFT into one matrix (f32 premultiply, bf16 store).
        H = jnp.dot(F, G, preferred_element_type=jnp.float32).astype(jnp.bfloat16)
        if gn == 1:   # grid-invariant -> single buffer
            h_spec = pl.BlockSpec((n, tile_n), lambda i, j: (0, j),
                                  pipeline_mode=pl.Buffered(1))
        else:
            h_spec = pl.BlockSpec((n, tile_n), lambda i, j: (0, j))
        cost = pl.CostEstimate(
            flops=int(2 * b * n * n_mat),
            transcendentals=0,
            bytes_accessed=int(8 * b * n + 2 * n * n_mat),
        )
        out = pl.pallas_call(
            _spectral_conv0d_single_kernel,
            out_shape=out_shape,
            grid=grid,
            in_specs=[x_spec, h_spec],
            out_specs=out_spec,
            compiler_params=cparams,
            cost_estimate=cost,
        )(x32, H)
    else:
        Fb = F.astype(jnp.bfloat16)
        Gb = G.astype(jnp.bfloat16)
        f_spec = pl.BlockSpec((n, m2_pad), lambda i, j: (0, 0),
                              pipeline_mode=pl.Buffered(1))
        if gn == 1:
            g_spec = pl.BlockSpec((m2_pad, tile_n), lambda i, j: (0, j),
                                  pipeline_mode=pl.Buffered(1))
        else:
            g_spec = pl.BlockSpec((m2_pad, tile_n), lambda i, j: (0, j))
        cost = pl.CostEstimate(
            flops=int(2 * b * n * m2_pad + 2 * b * m2_pad * n_mat),
            transcendentals=0,
            bytes_accessed=int(8 * b * n + 2 * n * m2_pad + 2 * m2_pad * n_mat),
        )
        out = pl.pallas_call(
            _spectral_conv0d_factored_kernel,
            out_shape=out_shape,
            grid=grid,
            in_specs=[x_spec, f_spec, g_spec],
            out_specs=out_spec,
            compiler_params=cparams,
            cost_estimate=cost,
        )(x32, Fb, Gb)

    return out


# ----------------------------- reference -----------------------------------


def spectral_conv0d_ref(x, weights):
    """Pure-JAX reference mirroring the PyTorch forward."""
    b, n = x.shape
    modes = weights.shape[1]
    x_ft = jnp.fft.rfft(x)                                            # [B, n//2+1]
    wsum = jnp.sum(weights, axis=0)
    out_ft = jnp.zeros((b, n // 2 + 1), dtype=jnp.complex64)
    out_ft = out_ft.at[:, :modes].set(x_ft[:, :modes] * wsum[None, :])
    return jnp.fft.irfft(out_ft, n=n).astype(jnp.float32)


# ----------------------------- test ----------------------------------------


def _make_inputs(key, b, c, n, modes):
    kx, kwr, kwi = jax.random.split(key, 3)
    x = jax.random.normal(kx, (b, n), dtype=jnp.float32)
    scale = 1.0 / (c * c)  # mirrors scale * torch.rand(in_channels, modes, cfloat)
    w_re = scale * jax.random.uniform(kwr, (c, modes), dtype=jnp.float32)
    w_im = scale * jax.random.uniform(kwi, (c, modes), dtype=jnp.float32)
    return x, (w_re + 1j * w_im).astype(jnp.complex64)


if __name__ == "__main__":
    key = jax.random.PRNGKey(0)
    k1, k2, k3, k4 = jax.random.split(key, 4)

    def _check(x, w, **kw):
        out = jax.block_until_ready(spectral_conv0d(x, w, **kw))
        ref = spectral_conv0d_ref(x, w)
        np.testing.assert_allclose(np.asarray(out), np.asarray(ref),
                                   rtol=2e-2, atol=2e-2)

    # 1) Small module-default-like shapes (factored path, single grid step).
    x1, w1 = _make_inputs(k1, 4, 3, 16, 5)
    _check(x1, w1)

    # 2) Multi-tile batch with a ragged last tile (factored path, gb > 1).
    x2, w2 = _make_inputs(k2, 20, 3, 512, 12)
    _check(x2, w2, block_b=8)

    # 3) Batch >= padded mode dim -> fused single-matmul (x @ H) path.
    x3, w3 = _make_inputs(k3, 160, 3, 64, 9)
    _check(x3, w3)

    # 4) Small batch, large n -> column-parallel grid (gn > 1, 2-TC v7x).
    x4, w4 = _make_inputs(k4, 8, 3, 1024, 8)
    _check(x4, w4)

    print("KERNEL_OK")
</pallas_src>

<mosaic_0001>
module attributes {stable_mosaic.version = 11 : i64} {
  func.func @_spectral_conv0d_factored_kernel(%arg0: i32, %arg1: i32, %arg2: memref<4x16xf32, #tpu.memory_space<vmem>>, %arg3: memref<16x128xbf16, #tpu.memory_space<vmem>>, %arg4: memref<128x16xbf16, #tpu.memory_space<vmem>>, %arg5: memref<4x16xf32, #tpu.memory_space<vmem>>) attributes {dimension_semantics = [#tpu.dimension_semantics<parallel>, #tpu.dimension_semantics<parallel>], iteration_bounds = array<i64: 1, 1>, scalar_prefetch = 0 : i64, scratch_operands = 0 : i64, tpu.core_type = #tpu.core_type<tc>, window_params = [{transform_indices = @transform_0, window_bounds = array<i64: 4, 16>}, {pipeline_mode = #tpu.pipeline_mode<synchronous>, transform_indices = @transform_1, window_bounds = array<i64: 16, 128>}, {pipeline_mode = #tpu.pipeline_mode<synchronous>, transform_indices = @transform_2, window_bounds = array<i64: 128, 16>}, {transform_indices = @transform_3, window_bounds = array<i64: 4, 16>}]} {
    %c0 = arith.constant 0 : index
    %c0_0 = arith.constant 0 : index
    %0 = vector.load %arg2[%c0, %c0_0] : memref<4x16xf32, #tpu.memory_space<vmem>>, vector<4x16xf32>
    %1 = arith.truncf %0 : vector<4x16xf32> to vector<4x16xbf16>
    %c0_1 = arith.constant 0 : index
    %c0_2 = arith.constant 0 : index
    %2 = vector.load %arg3[%c0_1, %c0_2] : memref<16x128xbf16, #tpu.memory_space<vmem>>, vector<16x128xbf16>
    %cst = arith.constant dense<0.000000e+00> : vector<4x128xf32>
    %3 = tpu.matmul %1, %2, %cst {dimension_numbers = #tpu.dot_dimension_numbers<[1], [0], [0], [1], [0, 0, 1, 1], [], []>} : vector<4x16xbf16>, vector<16x128xbf16>, vector<4x128xf32> -> vector<4x128xf32>
    %4 = arith.truncf %3 : vector<4x128xf32> to vector<4x128xbf16>
    %c0_3 = arith.constant 0 : index
    %c0_4 = arith.constant 0 : index
    %5 = vector.load %arg4[%c0_3, %c0_4] : memref<128x16xbf16, #tpu.memory_space<vmem>>, vector<128x16xbf16>
    %cst_5 = arith.constant dense<0.000000e+00> : vector<4x16xf32>
    %6 = tpu.matmul %4, %5, %cst_5 {dimension_numbers = #tpu.dot_dimension_numbers<[1], [0], [0], [1], [0, 0, 1, 1], [], []>} : vector<4x128xbf16>, vector<128x16xbf16>, vector<4x16xf32> -> vector<4x16xf32>
    %c0_6 = arith.constant 0 : index
    %c0_7 = arith.constant 0 : index
    %7 = vector.load %arg5[%c0_6, %c0_7] : memref<4x16xf32, #tpu.memory_space<vmem>>, vector<4x16xf32>
    tpu.vector_store %arg5[%c0_6, %c0_7], %6 {strides = array<i32>} : memref<4x16xf32, #tpu.memory_space<vmem>>, vector<4x16xf32>,
    return
  }
  func.func @transform_0(%arg0: i32, %arg1: i32) -> (i32, i32) {
    %c0_i32 = arith.constant 0 : i32
    %c0_i32_0 = arith.constant 0 : i32
    return %arg0, %c0_i32 : i32, i32
  }
  func.func @transform_1(%arg0: i32, %arg1: i32) -> (i32, i32) {
    %c0_i32 = arith.constant 0 : i32
    %c0_i32_0 = arith.constant 0 : i32
    %c0_i32_1 = arith.constant 0 : i32
    return %c0_i32, %c0_i32_0 : i32, i32
  }
  func.func @transform_2(%arg0: i32, %arg1: i32) -> (i32, i32) {
    %c0_i32 = arith.constant 0 : i32
    %c0_i32_0 = arith.constant 0 : i32
    return %c0_i32, %arg1 : i32, i32
  }
  func.func @transform_3(%arg0: i32, %arg1: i32) -> (i32, i32) {
    %c0_i32 = arith.constant 0 : i32
    return %arg0, %arg1 : i32, i32
  }
}

</mosaic_0001>

<bundles_post_ra>
// kernel: tpu_custom_call.1
= control target key start
LH: loop header
LB: loop body
LE: loop exit
PB: predicated region body
PF: predicated region fallthrough
CT: control target
= control target key end

     0   :  { %vm26_vm0 = vcmask 130048   ;;  %s266_s0 = inlined_call_operand.vmem [shape: f32[4,16], index: 0, kind: input, shape index: {}]   ;;  %s267_s1 = inlined_call_operand.vmem [shape: bf16[16,128], index: 1, kind: input, shape index: {}]   ;;  %s268_s2 = inlined_call_operand.vmem [shape: bf16[128,16], index: 2, kind: input, shape index: {}]   ;;  %s269_s3 = inlined_call_operand.hbm [shape: f32[4,16], index: 3, kind: output, shape index: {}]  }
   0x1   :  { %v176_v0 = vld [vmem:[%s267_s1] sm:$0xff]  ;;  %v184_v2 = vld [vmem:[%s268_s2 + $0x38] sm:$0xff]  ;;  %v183_v4 = vld [vmem:[%s268_s2 + $0x30] sm:$0xff] }
   0x2   :  { %v16_v1 = vld [vmem:[%s266_s0] sm:$0xf]  ;;  %37 = vmatpush.bf16.msra.mxu0 %v176_v0  ;;  %108 = vmatpush.bf16.msra.mxu1 %v184_v2 }
   0x3   :  { %v17_v3 = vpack.c.bf16 %v16_v1, %v16_v1 }
   0x4   :  { %8 = vsyncpa [#allocation3], 0  ;;  %v182_v5 = vld [vmem:[%s268_s2 + $0x28] sm:$0xff]  ;;  %v181_v6 = vld [vmem:[%s268_s2 + $0x20] sm:$0xff]  ;;  %s212_s30 = smov [#allocation2]   ;;  %s130_s7 = sshll.u32 %s269_s3, 4  ;;  %s131_s7 = int_to_ptr.hbm [resolvable:$true] %s130_s7 }
   0x5   :  { %143 = vmatmul.msk.bf16.vlgmr.msra.gmra.mxu0 %vm26_vm0, %v17_v3  ;;  %v180_v7 = vld [vmem:[%s268_s2 + $0x18] sm:$0xff]  ;;  %v179_v8 = vld [vmem:[%s268_s2 + $0x10] sm:$0xff]  ;;  %v178_v9 = vld [vmem:[%s268_s2 + $0x8] sm:$0xff]  ;;  %s128_s4 = sshll.u32 %s212_s30, 4  ;;  %vm121_vm1 = vcmask 125952   ;;  %s129_s4 = int_to_ptr.vmem [resolvable:$true] %s128_s4 }
   0x6   :  { %109 = vmatpush.bf16.msra.mxu1 %v183_v4  ;;  %v177_v10 = vld [vmem:[%s268_s2] sm:$0xff] }
   0xa   :  { %110 = vmatpush.bf16.msra.mxu1 %v182_v5 }
   0xe   :  { %111 = vmatpush.bf16.msra.mxu1 %v181_v6 }
  0x12   :  { %112 = vmatpush.bf16.msra.mxu1 %v180_v7 }
  0x16   :  { %113 = vmatpush.bf16.msra.mxu1 %v179_v8 }
  0x1a   :  { %114 = vmatpush.bf16.msra.mxu1 %v178_v9 }
  0x1e   :  { %115 = vmatpush.bf16.msra.mxu1 %v177_v10 }
  0x82   :  { %v39_v11 = vpop.f32.mrf.mxu0 }
  0x83   :  { %v43_v12 = vpack.c.bf16 %v39_v11, %v39_v11 }
  0x85   :  { %116 = vmatmul.bf16.vlgmr.msra.gmra.mxu1 %v43_v12 }
  0x8a   :  { %v41_v13 = vpop.f32.mrf.mxu0 }
 0x102   :  { %v117_v14 = vpop.f32.mrf.mxu1 }
 0x103   :  { %122 = vst.msk [vmem:[#allocation2] sm:$0xf] %vm121_vm1, %v117_v14 }
 0x104   :  { %133 = dma.vmem_to_hbm [thread:$0]  %s129_s4, 64, %s131_s7, [#allocation3]  }
 0x10a   :  { %v119_v15 = vpop.f32.mrf.mxu1 }
 0x10b   :  { %210 = dma.done.wait [#allocation3], 64  }
 0x10c   :  { %211 = vsyncadd [#allocation3], 4294967232 }
 0x10d   :  { %138 = vsyncpa [#allocation3], 1 }

</bundles_post_ra>
